<compile_context>
chip_gen: v5e
topology: v5e:2x2
jax: 0.10.0
libtpu: 0.0.40
codegen_flags: <defaults>
</compile_context>

<pallas_src>
from functools import partial

import jax
import jax.numpy as jnp
from jax import lax
from jax.experimental import pallas as pl
from jax.experimental.pallas import tpu as pltpu


LN_EPS = 1e-6  # typical ViT LayerNorm eps


def _layernorm(x, gamma, beta, eps=LN_EPS):
    """LayerNorm over the last axis. x f32 (R, D); gamma/beta f32 (1, D)."""
    mu = jnp.mean(x, axis=-1, keepdims=True)
    var = jnp.mean((x - mu) ** 2, axis=-1, keepdims=True)
    return (x - mu) * jax.lax.rsqrt(var + eps) * gamma + beta


def _erf(x):
    """erf via Abramowitz & Stegun 7.1.26 (|err| < 1.5e-7); exp + VPU polynomial
    only, so it always lowers in Mosaic."""
    s = jnp.where(x < 0, -1.0, 1.0).astype(x.dtype)
    a = jnp.abs(x)
    t = 1.0 / (1.0 + 0.3275911 * a)
    poly = t * (0.254829592
                + t * (-0.284496736
                       + t * (1.421413741
                              + t * (-1.453152027 + t * 1.061405429))))
    return s * (1.0 - poly * jnp.exp(-a * a))


def _gelu(x, approximate):
    if approximate:  # tanh form -> EUP slot (option for VALU-bound v5e)
        c = 0.7978845608028654  # sqrt(2/pi)
        return 0.5 * x * (1.0 + jnp.tanh(c * (x + 0.044715 * x * x * x)))
    return 0.5 * x * (1.0 + _erf(x * 0.7071067811865476))  # exact (torch.nn.GELU())


# ---------------------------------------------------------------------------
# Kernel A: LN1 + fused QKV + softmax attention + (folded) output projection.
# grid = (batch, head_group); g is the inner "arbitrary" axis; the projected
# attention output is accumulated in f32 scratch and written once per batch
# row as a lane-dense (N, D) slab.
# ---------------------------------------------------------------------------
def attention_kernel(heads_per_group, compute_dtype,
                     x_ref, ln1_g_ref, ln1_b_ref,
                     wqkv_ref, bqkv_ref, wproj_ref,
                     y_ref, xn_ref, acc_ref):
    g = pl.program_id(1)
    n_groups = pl.num_programs(1)
    HG = heads_per_group
    wd = wqkv_ref.shape[-1] // 3          # HG * dh
    dh = wd // HG
    exact_softmax = (jnp.dtype(compute_dtype) == jnp.float32)

    # LN1(x) is shared by every head group: compute it once per batch row
    # (g is sequential) and cache in VMEM scratch; also zero the accumulator.
    @pl.when(g == 0)
    def _():
        x = x_ref[0].astype(jnp.float32)
        xn = _layernorm(x, ln1_g_ref[...], ln1_b_ref[...])
        xn_ref[...] = xn.astype(compute_dtype)
        acc_ref[...] = jnp.zeros_like(acc_ref)

    xn_c = xn_ref[...]                                        # (N, D) compute dtype

    # Fused QKV projection for this head group: one wide MXU matmul with f32
    # accumulation (1/sqrt(dh) already folded into the q columns / bias).
    qkv = jnp.dot(xn_c, wqkv_ref[0],
                  preferred_element_type=jnp.float32) + bqkv_ref[0]   # (N, 3*wd)

    wproj_g = wproj_ref[0]                                    # (wd, D) compute dtype

    # Per-head attention (static unrolled loop, all 2-D ops). Each head's
    # contribution to the output projection is accumulated, so the only store
    # is the full-width f32 accumulator at the last head group.
    # TODO(synk): flash-style KV tiling for very long sequences.
    y_g = None
    for h in range(HG):
        q = qkv[:, h * dh:(h + 1) * dh].astype(compute_dtype)             # (N, dh)
        k = qkv[:, wd + h * dh:wd + (h + 1) * dh].astype(compute_dtype)
        v = qkv[:, 2 * wd + h * dh:2 * wd + (h + 1) * dh].astype(compute_dtype)

        s = lax.dot_general(q, k, (((1,), (1,)), ((), ())),
                            preferred_element_type=jnp.float32)           # (N, N)
        s = s - jnp.max(s, axis=-1, keepdims=True)
        p = jnp.exp(s)
        denom = jnp.sum(p, axis=-1, keepdims=True)
        if exact_softmax:
            p = p / denom
        else:
            p = p * pl.reciprocal(denom, approx=True)                     # EUP slot

        o = jnp.dot(p.astype(compute_dtype), v,
                    preferred_element_type=jnp.float32)                   # (N, dh)
        contrib = jnp.dot(o.astype(compute_dtype),
                          wproj_g[h * dh:(h + 1) * dh, :],
                          preferred_element_type=jnp.float32)             # (N, D)
        y_g = contrib if y_g is None else y_g + contrib

    acc_ref[...] += y_g

    @pl.when(g == n_groups - 1)
    def _():
        y_ref[0] = acc_ref[...].astype(y_ref.dtype)


# ---------------------------------------------------------------------------
# Kernel B: bproj + LayerScale1 + residual, then LN2 + MLP + LayerScale2 +
# residual.  Token-tiled: grid = (batch, token_tile) -> second parallel axis.
# ---------------------------------------------------------------------------
def proj_mlp_kernel(compute_dtype, gelu_approximate,
                    x_ref, y_ref, bproj_ref, ls1_ref,
                    ln2_g_ref, ln2_b_ref,
                    wfc1_ref, bfc1_ref, wfc2_ref, bfc2_ref, ls2_ref,
                    o_ref):
    x = x_ref[0].astype(jnp.float32)                          # (TN, D)
    y = y_ref[0].astype(jnp.float32) + bproj_ref[...]         # projected attention
    x = x + y * ls1_ref[...]

    xn = _layernorm(x, ln2_g_ref[...], ln2_b_ref[...]).astype(compute_dtype)
    h1 = jnp.dot(xn, wfc1_ref[...],
                 preferred_element_type=jnp.float32) + bfc1_ref[...]
    h1 = _gelu(h1, gelu_approximate)
    h2 = jnp.dot(h1.astype(compute_dtype), wfc2_ref[...],
                 preferred_element_type=jnp.float32) + bfc2_ref[...]
    x = x + h2 * ls2_ref[...]

    o_ref[0] = x.astype(o_ref.dtype)


def _vmem_budget_bytes():
    """Generation-aware VMEM request: ~48 MiB on v7x (64 MiB physical),
    ~96 MiB on v5e/v6e (128 MiB physical)."""
    try:
        cap = int(pltpu.get_tpu_info().vmem_capacity_bytes)
    except Exception:
        cap = 128 * 1024 * 1024
    return min(cap - cap // 4, 112 * 1024 * 1024)


def encoder_layer(x, params, n_heads, *, compute_dtype=jnp.bfloat16,
                  token_tile=None, heads_per_group=None,
                  single_buffer_weights=None, gelu_approximate=False,
                  lane_group_target=256):
    """Pre-norm ViT encoder block forward, eval mode. x: (B, N, D).

    For best layout D should be a multiple of 128 and N a multiple of the
    sublane pack (8 for f32 / 16 for bf16).  N is only tiled, never padded:
    there is no key-mask support for padded sequences.
    """
    B, N, D = x.shape
    assert D % n_heads == 0
    dh = D // n_heads
    Dh = params["wfc1"].shape[1]
    scale = float(dh) ** -0.5
    cdt = jnp.dtype(compute_dtype)
    f32 = jnp.float32
    x_bytes = jnp.dtype(x.dtype).itemsize
    c_bytes = cdt.itemsize

    vmem_budget = _vmem_budget_bytes()
    small_vmem = vmem_budget < 56 * 1024 * 1024              # v7x-class chip

    if single_buffer_weights is None:
        # Grid-constant weight blocks never re-DMA, so their second pipeline
        # buffer is pure VMEM waste; only force single-buffering where VMEM is
        # the scarce resource (v7x) to keep the portable default conservative.
        single_buffer_weights = small_vmem

    # ---- head grouping: aim for a >=256-lane-wide fused QKV output per step,
    # shrink if the per-group f32 score/prob buffers would not fit VMEM.
    if heads_per_group is None:
        heads_per_group = min(n_heads, max(1, lane_group_target // dh))
        while heads_per_group > 1 and 2 * heads_per_group * N * N * 4 > vmem_budget // 3:
            heads_per_group -= 1
    while n_heads % heads_per_group:
        heads_per_group -= 1
    G = n_heads // heads_per_group
    Wd = heads_per_group * dh

    # ---- token tiling for the MLP kernel (sublane-pack aware; cap 256 on v7x).
    if token_tile is None:
        pack = 16 if min(x_bytes, c_bytes) < 4 else 8
        cap = 256 if small_vmem else 512
        token_tile = N   # fallback: whole sequence (fine for small / aligned N)
        for cand in (512, 256, 128, 64, 32, 16, 8):
            if cand <= cap and N % cand == 0 and cand % pack == 0:
                token_tile = cand
                break
    assert N % token_tile == 0
    T = N // token_tile

    # ---- parameter preparation (one-time XLA layout work) -----------------
    wqkv = params["wqkv"]                                     # (D, 3D) = [q|k|v]
    bqkv = params["bqkv"].reshape(-1)                         # (3D,)

    def group_w(w2d, s=1.0):                                  # (D, D) -> (G, D, Wd)
        return jnp.transpose((w2d * s).reshape(D, G, Wd), (1, 0, 2))

    def group_b(b1d, s=1.0):                                  # (D,) -> (G, 1, Wd)
        return (b1d * s).reshape(G, 1, Wd)

    # Fused per-group QKV weight (q columns carry the attention scale).
    wqkv_g = jnp.concatenate(
        [group_w(wqkv[:, :D], scale),
         group_w(wqkv[:, D:2 * D]),
         group_w(wqkv[:, 2 * D:])], axis=-1).astype(cdt)      # (G, D, 3*Wd)
    bqkv_g = jnp.concatenate(
        [group_b(bqkv[:D], scale),
         group_b(bqkv[D:2 * D]),
         group_b(bqkv[2 * D:])], axis=-1).astype(f32)         # (G, 1, 3*Wd)
    wproj_g = params["wproj"].reshape(G, Wd, D).astype(cdt)   # rows grouped by head

    ln1_g = params["ln1_g"].reshape(1, D).astype(f32)
    ln1_b = params["ln1_b"].reshape(1, D).astype(f32)
    ln2_g = params["ln2_g"].reshape(1, D).astype(f32)
    ln2_b = params["ln2_b"].reshape(1, D).astype(f32)
    ls1 = params["ls1"].reshape(1, D).astype(f32)
    ls2 = params["ls2"].reshape(1, D).astype(f32)
    bproj = params["bproj"].reshape(1, D).astype(f32)
    wfc1 = params["wfc1"].astype(cdt)
    bfc1 = params["bfc1"].reshape(1, Dh).astype(f32)
    wfc2 = params["wfc2"].astype(cdt)
    bfc2 = params["bfc2"].reshape(1, D).astype(f32)

    def _const(shape):
        return pl.BlockSpec(shape, lambda *_: (0,) * len(shape))

    def _weight(shape, index_map, single):
        if single:
            return pl.BlockSpec(shape, index_map, pipeline_mode=pl.Buffered(1))
        return pl.BlockSpec(shape, index_map)

    # ---------------- kernel A: attention + folded projection --------------
    attn_cost = pl.CostEstimate(
        flops=int(B * (8 * N * D * D + 4 * n_heads * N * N * dh)),
        transcendentals=int(B * n_heads * N * N),
        bytes_accessed=int(B * N * D * x_bytes + B * 4 * D * D * c_bytes
                           + B * N * D * c_bytes),
    )
    sb_a = single_buffer_weights and G == 1   # only if the block never changes
    y_attn = pl.pallas_call(
        partial(attention_kernel, heads_per_group, cdt),
        out_shape=jax.ShapeDtypeStruct((B, N, D), cdt),   # bf16 intermediate
        grid_spec=pltpu.PrefetchScalarGridSpec(
            num_scalar_prefetch=0,
            grid=(B, G),
            in_specs=[
                pl.BlockSpec((1, N, D), lambda b, g: (b, 0, 0)),
                _const((1, D)),                               # ln1_g
                _const((1, D)),                               # ln1_b
                _weight((1, D, 3 * Wd), lambda b, g: (g, 0, 0), sb_a),
                pl.BlockSpec((1, 1, 3 * Wd), lambda b, g: (g, 0, 0)),
                _weight((1, Wd, D), lambda b, g: (g, 0, 0), sb_a),
            ],
            out_specs=pl.BlockSpec((1, N, D), lambda b, g: (b, 0, 0)),
            scratch_shapes=[pltpu.VMEM((N, D), cdt),          # cached LN1(x)
                            pltpu.VMEM((N, D), jnp.float32)], # projection acc
        ),
        compiler_params=pltpu.CompilerParams(
            dimension_semantics=("parallel", "arbitrary"),
            vmem_limit_bytes=vmem_budget),
        cost_estimate=attn_cost,
    )(x, ln1_g, ln1_b, wqkv_g, bqkv_g, wproj_g)

    # ---------------- kernel B: residual + MLP, grid = (B, token tiles) ----
    mlp_cost = pl.CostEstimate(
        flops=int(4 * B * N * D * Dh),
        transcendentals=int(B * N * Dh),
        bytes_accessed=int(B * N * D * (2 * x_bytes + c_bytes)
                           + 2 * D * Dh * c_bytes),
    )
    sb = single_buffer_weights
    # Note: input_output_aliases={0: 0} would let x's buffer be reused for the
    # output under jit-with-donation; omitted here since eagerly it just adds a copy.
    out = pl.pallas_call(
        partial(proj_mlp_kernel, cdt, gelu_approximate),
        out_shape=jax.ShapeDtypeStruct((B, N, D), x.dtype),
        grid_spec=pltpu.PrefetchScalarGridSpec(
            num_scalar_prefetch=0,
            grid=(B, T),
            in_specs=[
                pl.BlockSpec((1, token_tile, D), lambda b, t: (b, t, 0)),   # x
                pl.BlockSpec((1, token_tile, D), lambda b, t: (b, t, 0)),   # y_attn
                _const((1, D)),                                # bproj
                _const((1, D)),                                # ls1
                _const((1, D)),                                # ln2_g
                _const((1, D)),                                # ln2_b
                _weight((D, Dh), lambda b, t: (0, 0), sb),     # wfc1
                _const((1, Dh)),                               # bfc1
                _weight((Dh, D), lambda b, t: (0, 0), sb),     # wfc2
                _const((1, D)),                                # bfc2
                _const((1, D)),                                # ls2
            ],
            out_specs=pl.BlockSpec((1, token_tile, D), lambda b, t: (b, t, 0)),
        ),
        compiler_params=pltpu.CompilerParams(
            dimension_semantics=("parallel", "parallel"),
            vmem_limit_bytes=vmem_budget),
        cost_estimate=mlp_cost,
    )(x, y_attn, bproj, ls1, ln2_g, ln2_b, wfc1, bfc1, wfc2, bfc2, ls2)
    return out


def init_params(key, embed_dim, mlp_ratio, init_values=1e-5):
    D = embed_dim
    Dh = int(embed_dim * mlp_ratio)
    ks = jax.random.split(key, 10)
    std = 0.02
    nrm = jax.random.normal
    return {
        "ln1_g": 1.0 + 0.1 * nrm(ks[4], (1, D), jnp.float32),
        "ln1_b": 0.1 * nrm(ks[5], (1, D), jnp.float32),
        "wqkv": std * nrm(ks[0], (D, 3 * D), jnp.float32),
        "bqkv": 0.02 * nrm(ks[6], (1, 3 * D), jnp.float32),
        "wproj": std * nrm(ks[1], (D, D), jnp.float32),
        "bproj": 0.02 * nrm(ks[7], (1, D), jnp.float32),
        "ls1": init_values * jnp.ones((1, D), jnp.float32),
        "ln2_g": 1.0 + 0.1 * nrm(ks[8], (1, D), jnp.float32),
        "ln2_b": 0.1 * nrm(ks[9], (1, D), jnp.float32),
        "wfc1": std * nrm(ks[2], (D, Dh), jnp.float32),
        "bfc1": 0.02 * nrm(ks[6], (1, Dh), jnp.float32),
        "wfc2": std * nrm(ks[3], (Dh, D), jnp.float32),
        "bfc2": 0.02 * nrm(ks[7], (1, D), jnp.float32),
        "ls2": init_values * jnp.ones((1, D), jnp.float32),
    }


def encoder_layer_ref(x, params, n_heads):
    """Pure-JAX reference (eval-mode forward of the PyTorch module)."""
    B, N, D = x.shape
    dh = D // n_heads

    def ln(v, g, b):
        mu = jnp.mean(v, -1, keepdims=True)
        var = jnp.mean((v - mu) ** 2, -1, keepdims=True)
        return (v - mu) * jax.lax.rsqrt(var + LN_EPS) * g[0] + b[0]

    xn = ln(x, params["ln1_g"], params["ln1_b"])
    qkv = xn @ params["wqkv"] + params["bqkv"][0]
    q, k, v = jnp.split(qkv, 3, axis=-1)
    q = q.reshape(B, N, n_heads, dh).transpose(0, 2, 1, 3)
    k = k.reshape(B, N, n_heads, dh).transpose(0, 2, 1, 3)
    v = v.reshape(B, N, n_heads, dh).transpose(0, 2, 1, 3)
    s = jnp.einsum("bhqd,bhkd->bhqk", q, k) * (dh ** -0.5)
    p = jax.nn.softmax(s, axis=-1)
    o = jnp.einsum("bhqk,bhkd->bhqd", p, v).transpose(0, 2, 1, 3).reshape(B, N, D)
    y = o @ params["wproj"] + params["bproj"][0]
    x = x + y * params["ls1"][0]

    xn2 = ln(x, params["ln2_g"], params["ln2_b"])
    h1 = jax.nn.gelu(xn2 @ params["wfc1"] + params["bfc1"][0], approximate=False)
    h2 = h1 @ params["wfc2"] + params["bfc2"][0]
    return x + h2 * params["ls2"][0]


if __name__ == "__main__":
    B, N, D = 2, 16, 128        # batch, tokens, embed_dim (lane/sublane aligned)
    n_heads = 4                 # head_dim = 32
    mlp_ratio = 4

    key = jax.random.PRNGKey(0)
    kx, kp = jax.random.split(key)
    x = jax.random.normal(kx, (B, N, D), jnp.float32)
    # init_values=1.0 so both branches contribute meaningfully to the check.
    params = init_params(kp, D, mlp_ratio, init_values=1.0)
    ref = encoder_layer_ref(x, params, n_heads)

    # --- f32 compute path; heads_per_group=2 exercises the multi-group
    #     accumulate-over-g projection path of kernel A.
    out_f32 = encoder_layer(x, params, n_heads,
                            compute_dtype=jnp.float32, heads_per_group=2)
    out_f32 = jax.block_until_ready(out_f32)
    assert out_f32.shape == (B, N, D)
    err = float(jnp.max(jnp.abs(out_f32 - ref)))
    assert err < 1e-2, f"f32 kernel mismatch vs reference (max abs err {err})"

    # --- bf16 compute path with default grouping / tiling (MXU-friendly).
    x_bf = x.astype(jnp.bfloat16)
    out_bf = encoder_layer(x_bf, params, n_heads, compute_dtype=jnp.bfloat16)
    out_bf = jax.block_until_ready(out_bf)
    params_q = dict(params)
    for wname in ("wqkv", "wproj", "wfc1", "wfc2"):
        params_q[wname] = params[wname].astype(jnp.bfloat16).astype(jnp.float32)
    ref_bf = encoder_layer_ref(x_bf.astype(jnp.float32), params_q, n_heads)
    err_bf = float(jnp.max(jnp.abs(out_bf.astype(jnp.float32) - ref_bf)))
    assert err_bf < 1e-1, f"bf16 kernel mismatch vs reference (max abs err {err_bf})"

    print("KERNEL_OK")
</pallas_src>

<mosaic_0001>
module attributes {stable_mosaic.version = 11 : i64} {
  func.func @attention_kernel(%arg0: i32, %arg1: i32, %arg2: memref<1x16x128xf32, #tpu.memory_space<vmem>>, %arg3: memref<1x128xf32, #tpu.memory_space<vmem>>, %arg4: memref<1x128xf32, #tpu.memory_space<vmem>>, %arg5: memref<1x128x192xf32, #tpu.memory_space<vmem>>, %arg6: memref<1x1x192xf32, #tpu.memory_space<vmem>>, %arg7: memref<1x64x128xf32, #tpu.memory_space<vmem>>, %arg8: memref<1x16x128xf32, #tpu.memory_space<vmem>>, %arg9: memref<16x128xf32, #tpu.memory_space<vmem>>, %arg10: memref<16x128xf32, #tpu.memory_space<vmem>>) attributes {dimension_semantics = [#tpu.dimension_semantics<parallel>, #tpu.dimension_semantics<arbitrary>], iteration_bounds = array<i64: 2, 2>, scalar_prefetch = 0 : i64, scratch_operands = 2 : i64, tpu.core_type = #tpu.core_type<tc>, window_params = [{transform_indices = @transform_0, window_bounds = array<i64: 1, 16, 128>}, {pipeline_mode = #tpu.pipeline_mode<synchronous>, transform_indices = @transform_1, window_bounds = array<i64: 1, 128>}, {pipeline_mode = #tpu.pipeline_mode<synchronous>, transform_indices = @transform_2, window_bounds = array<i64: 1, 128>}, {transform_indices = @transform_3, window_bounds = array<i64: 1, 128, 192>}, {transform_indices = @transform_4, window_bounds = array<i64: 1, 1, 192>}, {transform_indices = @transform_5, window_bounds = array<i64: 1, 64, 128>}, {transform_indices = @transform_6, window_bounds = array<i64: 1, 16, 128>}]} {
    %c0_i32 = arith.constant 0 : i32
    %0 = arith.cmpi eq, %arg1, %c0_i32 : i32
    %1 = arith.extui %0 : i1 to i32
    %c0_i32_0 = arith.constant 0 : i32
    %2 = arith.cmpi ne, %1, %c0_i32_0 : i32
    scf.if %2 {
      %c0_26 = arith.constant 0 : index
      %c0_27 = arith.constant 0 : index
      %c0_28 = arith.constant 0 : index
      %52 = vector.load %arg2[%c0_26, %c0_27, %c0_28] : memref<1x16x128xf32, #tpu.memory_space<vmem>>, vector<1x16x128xf32>
      %53 = vector.shape_cast %52 : vector<1x16x128xf32> to vector<16x128xf32>
      %c0_29 = arith.constant 0 : index
      %c0_30 = arith.constant 0 : index
      %54 = vector.load %arg3[%c0_29, %c0_30] : memref<1x128xf32, #tpu.memory_space<vmem>>, vector<1x128xf32>
      %c0_31 = arith.constant 0 : index
      %c0_32 = arith.constant 0 : index
      %55 = vector.load %arg4[%c0_31, %c0_32] : memref<1x128xf32, #tpu.memory_space<vmem>>, vector<1x128xf32>
      %cst_33 = arith.constant dense<0.000000e+00> : vector<16xf32>
      %56 = vector.multi_reduction <add>, %53, %cst_33 [1] : vector<16x128xf32> to vector<16xf32>
      %57 = vector.shape_cast %56 : vector<16xf32> to vector<16x1xf32>
      %cst_34 = arith.constant 1.280000e+02 : f32
      %58 = vector.broadcast %cst_34 : f32 to vector<16x1xf32>
      %59 = arith.divf %57, %58 : vector<16x1xf32>
      %60 = vector.broadcast %59 : vector<16x1xf32> to vector<16x128xf32>
      %61 = arith.subf %53, %60 : vector<16x128xf32>
      %62 = arith.mulf %61, %61 : vector<16x128xf32>
      %cst_35 = arith.constant dense<0.000000e+00> : vector<16xf32>
      %63 = vector.multi_reduction <add>, %62, %cst_35 [1] : vector<16x128xf32> to vector<16xf32>
      %64 = vector.shape_cast %63 : vector<16xf32> to vector<16x1xf32>
      %cst_36 = arith.constant 1.280000e+02 : f32
      %65 = vector.broadcast %cst_36 : f32 to vector<16x1xf32>
      %66 = arith.divf %64, %65 : vector<16x1xf32>
      %67 = vector.broadcast %59 : vector<16x1xf32> to vector<16x128xf32>
      %68 = arith.subf %53, %67 : vector<16x128xf32>
      %cst_37 = arith.constant 9.99999997E-7 : f32
      %69 = vector.broadcast %cst_37 : f32 to vector<16x1xf32>
      %70 = arith.addf %66, %69 : vector<16x1xf32>
      %71 = math.rsqrt %70 : vector<16x1xf32>
      %72 = vector.broadcast %71 : vector<16x1xf32> to vector<16x128xf32>
      %73 = arith.mulf %68, %72 : vector<16x128xf32>
      %74 = vector.broadcast %54 : vector<1x128xf32> to vector<16x128xf32>
      %75 = arith.mulf %73, %74 : vector<16x128xf32>
      %76 = vector.broadcast %55 : vector<1x128xf32> to vector<16x128xf32>
      %77 = arith.addf %75, %76 : vector<16x128xf32>
      %c0_38 = arith.constant 0 : index
      %c0_39 = arith.constant 0 : index
      %78 = vector.load %arg9[%c0_38, %c0_39] : memref<16x128xf32, #tpu.memory_space<vmem>>, vector<16x128xf32>
      tpu.vector_store %arg9[%c0_38, %c0_39], %77 {strides = array<i32>} : memref<16x128xf32, #tpu.memory_space<vmem>>, vector<16x128xf32>,
      %cst_40 = arith.constant 0.000000e+00 : f32
      %79 = vector.broadcast %cst_40 : f32 to vector<16x128xf32>
      %c0_41 = arith.constant 0 : index
      %c0_42 = arith.constant 0 : index
      %80 = vector.load %arg10[%c0_41, %c0_42] : memref<16x128xf32, #tpu.memory_space<vmem>>, vector<16x128xf32>
      tpu.vector_store %arg10[%c0_41, %c0_42], %79 {strides = array<i32>} : memref<16x128xf32, #tpu.memory_space<vmem>>, vector<16x128xf32>,
    } else {
    }
    %c0 = arith.constant 0 : index
    %c0_1 = arith.constant 0 : index
    %3 = vector.load %arg9[%c0, %c0_1] : memref<16x128xf32, #tpu.memory_space<vmem>>, vector<16x128xf32>
    %c0_2 = arith.constant 0 : index
    %c0_3 = arith.constant 0 : index
    %c0_4 = arith.constant 0 : index
    %4 = vector.load %arg5[%c0_2, %c0_3, %c0_4] : memref<1x128x192xf32, #tpu.memory_space<vmem>>, vector<1x128x192xf32>
    %5 = vector.shape_cast %4 : vector<1x128x192xf32> to vector<128x192xf32>
    %cst = arith.constant dense<0.000000e+00> : vector<16x192xf32>
    %6 = tpu.matmul %3, %5, %cst {dimension_numbers = #tpu.dot_dimension_numbers<[1], [0], [0], [1], [0, 0, 1, 1], [], []>} : vector<16x128xf32>, vector<128x192xf32>, vector<16x192xf32> -> vector<16x192xf32>
    %c0_5 = arith.constant 0 : index
    %c0_6 = arith.constant 0 : index
    %c0_7 = arith.constant 0 : index
    %7 = vector.load %arg6[%c0_5, %c0_6, %c0_7] : memref<1x1x192xf32, #tpu.memory_space<vmem>>, vector<1x1x192xf32>
    %8 = vector.shape_cast %7 : vector<1x1x192xf32> to vector<1x192xf32>
    %9 = vector.broadcast %8 : vector<1x192xf32> to vector<16x192xf32>
    %10 = arith.addf %6, %9 : vector<16x192xf32>
    %c0_8 = arith.constant 0 : index
    %c0_9 = arith.constant 0 : index
    %c0_10 = arith.constant 0 : index
    %11 = vector.load %arg7[%c0_8, %c0_9, %c0_10] : memref<1x64x128xf32, #tpu.memory_space<vmem>>, vector<1x64x128xf32>
    %12 = vector.shape_cast %11 : vector<1x64x128xf32> to vector<64x128xf32>
    %13 = vector.extract_strided_slice %10 {offsets = [0, 0], sizes = [16, 32], strides = [1, 1]} : vector<16x192xf32> to vector<16x32xf32>
    %14 = vector.extract_strided_slice %10 {offsets = [0, 64], sizes = [16, 32], strides = [1, 1]} : vector<16x192xf32> to vector<16x32xf32>
    %15 = vector.extract_strided_slice %10 {offsets = [0, 128], sizes = [16, 32], strides = [1, 1]} : vector<16x192xf32> to vector<16x32xf32>
    %cst_11 = arith.constant dense<0.000000e+00> : vector<16x16xf32>
    %16 = tpu.matmul %13, %14, %cst_11 {dimension_numbers = #tpu.dot_dimension_numbers<[1], [1], [0], [0], [0, 0, 1, 0], [], []>} : vector<16x32xf32>, vector<16x32xf32>, vector<16x16xf32> -> vector<16x16xf32>
    %cst_12 = arith.constant dense<0xFF800000> : vector<16xf32>
    %17 = vector.multi_reduction <maximumf>, %16, %cst_12 [1] : vector<16x16xf32> to vector<16xf32>
    %18 = vector.shape_cast %17 : vector<16xf32> to vector<16x1xf32>
    %19 = vector.broadcast %18 : vector<16x1xf32> to vector<16x16xf32>
    %20 = arith.subf %16, %19 : vector<16x16xf32>
    %21 = math.exp %20 : vector<16x16xf32>
    %cst_13 = arith.constant dense<0.000000e+00> : vector<16xf32>
    %22 = vector.multi_reduction <add>, %21, %cst_13 [1] : vector<16x16xf32> to vector<16xf32>
    %23 = vector.shape_cast %22 : vector<16xf32> to vector<16x1xf32>
    %24 = vector.broadcast %23 : vector<16x1xf32> to vector<16x16xf32>
    %25 = arith.divf %21, %24 : vector<16x16xf32>
    %cst_14 = arith.constant dense<0.000000e+00> : vector<16x32xf32>
    %26 = tpu.matmul %25, %15, %cst_14 {dimension_numbers = #tpu.dot_dimension_numbers<[1], [0], [0], [1], [0, 0, 1, 1], [], []>} : vector<16x16xf32>, vector<16x32xf32>, vector<16x32xf32> -> vector<16x32xf32>
    %27 = vector.extract_strided_slice %12 {offsets = [0, 0], sizes = [32, 128], strides = [1, 1]} : vector<64x128xf32> to vector<32x128xf32>
    %cst_15 = arith.constant dense<0.000000e+00> : vector<16x128xf32>
    %28 = tpu.matmul %26, %27, %cst_15 {dimension_numbers = #tpu.dot_dimension_numbers<[1], [0], [0], [1], [0, 0, 1, 1], [], []>} : vector<16x32xf32>, vector<32x128xf32>, vector<16x128xf32> -> vector<16x128xf32>
    %29 = vector.extract_strided_slice %10 {offsets = [0, 32], sizes = [16, 32], strides = [1, 1]} : vector<16x192xf32> to vector<16x32xf32>
    %30 = vector.extract_strided_slice %10 {offsets = [0, 96], sizes = [16, 32], strides = [1, 1]} : vector<16x192xf32> to vector<16x32xf32>
    %31 = vector.extract_strided_slice %10 {offsets = [0, 160], sizes = [16, 32], strides = [1, 1]} : vector<16x192xf32> to vector<16x32xf32>
    %cst_16 = arith.constant dense<0.000000e+00> : vector<16x16xf32>
    %32 = tpu.matmul %29, %30, %cst_16 {dimension_numbers = #tpu.dot_dimension_numbers<[1], [1], [0], [0], [0, 0, 1, 0], [], []>} : vector<16x32xf32>, vector<16x32xf32>, vector<16x16xf32> -> vector<16x16xf32>
    %cst_17 = arith.constant dense<0xFF800000> : vector<16xf32>
    %33 = vector.multi_reduction <maximumf>, %32, %cst_17 [1] : vector<16x16xf32> to vector<16xf32>
    %34 = vector.shape_cast %33 : vector<16xf32> to vector<16x1xf32>
    %35 = vector.broadcast %34 : vector<16x1xf32> to vector<16x16xf32>
    %36 = arith.subf %32, %35 : vector<16x16xf32>
    %37 = math.exp %36 : vector<16x16xf32>
    %cst_18 = arith.constant dense<0.000000e+00> : vector<16xf32>
    %38 = vector.multi_reduction <add>, %37, %cst_18 [1] : vector<16x16xf32> to vector<16xf32>
    %39 = vector.shape_cast %38 : vector<16xf32> to vector<16x1xf32>
    %40 = vector.broadcast %39 : vector<16x1xf32> to vector<16x16xf32>
    %41 = arith.divf %37, %40 : vector<16x16xf32>
    %cst_19 = arith.constant dense<0.000000e+00> : vector<16x32xf32>
    %42 = tpu.matmul %41, %31, %cst_19 {dimension_numbers = #tpu.dot_dimension_numbers<[1], [0], [0], [1], [0, 0, 1, 1], [], []>} : vector<16x16xf32>, vector<16x32xf32>, vector<16x32xf32> -> vector<16x32xf32>
    %43 = vector.extract_strided_slice %12 {offsets = [32, 0], sizes = [32, 128], strides = [1, 1]} : vector<64x128xf32> to vector<32x128xf32>
    %cst_20 = arith.constant dense<0.000000e+00> : vector<16x128xf32>
    %44 = tpu.matmul %42, %43, %cst_20 {dimension_numbers = #tpu.dot_dimension_numbers<[1], [0], [0], [1], [0, 0, 1, 1], [], []>} : vector<16x32xf32>, vector<32x128xf32>, vector<16x128xf32> -> vector<16x128xf32>
    %45 = arith.addf %28, %44 : vector<16x128xf32>
    %c0_21 = arith.constant 0 : index
    %c0_22 = arith.constant 0 : index
    %46 = vector.load %arg10[%c0_21, %c0_22] : memref<16x128xf32, #tpu.memory_space<vmem>>, vector<16x128xf32>
    %47 = arith.addf %46, %45 : vector<16x128xf32>
    %c0_23 = arith.constant 0 : index
    %c0_24 = arith.constant 0 : index
    %48 = vector.load %arg10[%c0_23, %c0_24] : memref<16x128xf32, #tpu.memory_space<vmem>>, vector<16x128xf32>
    tpu.vector_store %arg10[%c0_23, %c0_24], %47 {strides = array<i32>} : memref<16x128xf32, #tpu.memory_space<vmem>>, vector<16x128xf32>,
    %c1_i32 = arith.constant 1 : i32
    %49 = arith.cmpi eq, %arg1, %c1_i32 : i32
    %50 = arith.extui %49 : i1 to i32
    %c0_i32_25 = arith.constant 0 : i32
    %51 = arith.cmpi ne, %50, %c0_i32_25 : i32
    scf.if %51 {
      %c0_26 = arith.constant 0 : index
      %c0_27 = arith.constant 0 : index
      %52 = vector.load %arg10[%c0_26, %c0_27] : memref<16x128xf32, #tpu.memory_space<vmem>>, vector<16x128xf32>
      %c0_28 = arith.constant 0 : index
      %c0_29 = arith.constant 0 : index
      %c0_30 = arith.constant 0 : index
      %53 = vector.load %arg8[%c0_28, %c0_29, %c0_30] : memref<1x16x128xf32, #tpu.memory_space<vmem>>, vector<1x16x128xf32>
      %54 = vector.shape_cast %53 : vector<1x16x128xf32> to vector<16x128xf32>
      %55 = vector.shape_cast %52 : vector<16x128xf32> to vector<1x16x128xf32>
      tpu.vector_store %arg8[%c0_28, %c0_29, %c0_30], %55 {strides = array<i32>} : memref<1x16x128xf32, #tpu.memory_space<vmem>>, vector<1x16x128xf32>,
    } else {
    }
    return
  }
  func.func @transform_0(%arg0: i32, %arg1: i32) -> (i32, i32, i32) {
    %c0_i32 = arith.constant 0 : i32
    %c0_i32_0 = arith.constant 0 : i32
    %c0_i32_1 = arith.constant 0 : i32
    return %arg0, %c0_i32, %c0_i32_0 : i32, i32, i32
  }
  func.func @transform_1(%arg0: i32, %arg1: i32) -> (i32, i32) {
    %c0_i32 = arith.constant 0 : i32
    %c0_i32_0 = arith.constant 0 : i32
    %c0_i32_1 = arith.constant 0 : i32
    return %c0_i32, %c0_i32_0 : i32, i32
  }
  func.func @transform_2(%arg0: i32, %arg1: i32) -> (i32, i32) {
    %c0_i32 = arith.constant 0 : i32
    %c0_i32_0 = arith.constant 0 : i32
    %c0_i32_1 = arith.constant 0 : i32
    return %c0_i32, %c0_i32_0 : i32, i32
  }
  func.func @transform_3(%arg0: i32, %arg1: i32) -> (i32, i32, i32) {
    %c0_i32 = arith.constant 0 : i32
    %c0_i32_0 = arith.constant 0 : i32
    %c0_i32_1 = arith.constant 0 : i32
    return %arg1, %c0_i32, %c0_i32_0 : i32, i32, i32
  }
  func.func @transform_4(%arg0: i32, %arg1: i32) -> (i32, i32, i32) {
    %c0_i32 = arith.constant 0 : i32
    %c0_i32_0 = arith.constant 0 : i32
    %c0_i32_1 = arith.constant 0 : i32
    return %arg1, %c0_i32, %c0_i32_0 : i32, i32, i32
  }
  func.func @transform_5(%arg0: i32, %arg1: i32) -> (i32, i32, i32) {
    %c0_i32 = arith.constant 0 : i32
    %c0_i32_0 = arith.constant 0 : i32
    %c0_i32_1 = arith.constant 0 : i32
    return %arg1, %c0_i32, %c0_i32_0 : i32, i32, i32
  }
  func.func @transform_6(%arg0: i32, %arg1: i32) -> (i32, i32, i32) {
    %c0_i32 = arith.constant 0 : i32
    %c0_i32_0 = arith.constant 0 : i32
    %c0_i32_1 = arith.constant 0 : i32
    return %arg0, %c0_i32, %c0_i32_0 : i32, i32, i32
  }
}

</mosaic_0001>

<bundles_post_ra>
// kernel: tpu_custom_call.1
= control target key start
LH: loop header
LB: loop body
LE: loop exit
PB: predicated region body
PF: predicated region fallthrough
CT: control target
= control target key end

     0   :  { %11 = vsyncpa [#allocation5], 0  ;;  %s1440_s0 = inlined_call_operand.vmem [shape: f32[2,16,128], index: 0, kind: input, shape index: {}]   ;;  %s1441_s1 = inlined_call_operand.vmem [shape: f32[1,128], index: 1, kind: input, shape index: {}]   ;;  %s1442_s2 = inlined_call_operand.vmem [shape: f32[1,128], index: 2, kind: input, shape index: {}]   ;;  %s1443_s3 = inlined_call_operand.vmem [shape: f32[2,128,192], index: 3, kind: input, shape index: {}]   ;;  %s1444_s4 = inlined_call_operand.vmem [shape: f32[2,1,192], index: 4, kind: input, shape index: {}]   ;;  %s1445_s5 = inlined_call_operand.vmem [shape: f32[2,64,128], index: 5, kind: input, shape index: {}]   ;;  %s1446_s6 = inlined_call_operand.hbm [shape: f32[2,16,128], index: 6, kind: output, shape index: {}]  }
   0x1   :  { %13 = vsyncpa [#allocation5 + $0x1], 0  ;;  %s1204_s21 = smov 0   ;;  %s1206_s22 = smov 0  }
   0x2   :  { %s1208_s23 = smov 0   ;;  %s1210_s24 = smov 0  }
   0x3   :  { %s1212_s25 = smov 0   ;;  %s1214_s26 = smov 0  }
   0x4   :  { %s1216_s27 = smov 0   ;;  %s1218_s28 = smov 0  }
   0x5 LB: > { %1453 = sst [smem:[#allocation7_spill]] %s1140_s23  ;;  %s919_s29 = sadd.s32 4294967295, %s1160_s28   ;;  %s1160_s28 = sphi %s1218_s28, %s19_s28   ;;  %s1156_s27 = sphi %s1216_s27, %s1469_s27   ;;  %s1152_s26 = sphi %s1214_s26, %s1468_s26   ;;  %s1148_s25 = sphi %s1212_s25, %s1467_s25   ;;  %s1144_s24 = sphi %s1210_s24, %s1466_s24   ;;  %s1140_s23 = sphi %s1208_s23, %s1465_s23   ;;  %s1136_s22 = sphi %s1206_s22, %s1471_s22   ;;  %s1132_s21 = sphi %s1204_s21, %s1470_s21  }
   0x6   : > { %1454 = sst [smem:[#allocation8_spill]] %s1152_s26  ;;  %s920_s30 = sadd.s32 4294967294, %s1160_s28  }
   0x7   : > { %1455 = sst [smem:[#allocation9_spill]] %s1156_s27  ;;  %s28_s7 = sadd.s32 1, %s1152_s26 }
   0x8   : > { %p29_p0 = scmp.ge.s32.totalorder %s28_s7, 2  ;;  %s31_s8 = sadd.s32 1, %s1156_s27 }
   0x9   : > { %p194_p1 = scmp.ne.s32.totalorder %s1140_s23, %s1136_s22  ;;  %p195_p2 = scmp.eq.s32.totalorder %s919_s29, 3 }
   0xa   : > { %s1473_s7 = smov (%p29_p0, %s28_s7), 0  ;;  %s1475_s8 = smov (!%p29_p0, %s31_s8), %s1156_s27 }
   0xb   : > { %1456 = sst [smem:[#allocation10_spill]] %s1473_s7  ;;  %p1253_p3 = por %p195_p2, %p194_p1 }
   0xc   : > { %p200_p4 = scmp.ne.s32.totalorder %s1136_s22, %s1132_s21  ;;  %p33_p5 = scmp.ge.s32.totalorder %s1475_s8, 2 }
   0xd   : > { %p201_p6 = scmp.eq.s32.totalorder %s920_s30, 3  ;;  %p923_p7 = scmp.ge.s32.totalorder %s1160_s28, 1 }
   0xe   : > { %p256_p8 = scmp.lt.s32.totalorder %s1160_s28, 5  ;;  %s1477_s8 = smov (%p33_p5, %s1475_s8), 0 }
   0xf   : > { %1458 = sst [smem:[#allocation11_spill]] %s1477_s8  ;;  %p1263_p9 = por %p201_p6, %p200_p4 }
  0x10   : > { %p257_p10 = pnand %p923_p7, %p256_p8  ;;  %s181_s11 = ssub.s32 %s1156_s27, %s1477_s8 }
  0x11   : > { %s1459_s10 = scalar_select %p1263_p9, 1, 0 }
  0x12   : > { %s184_s12 = sadd.s32 1, %s1140_s23  ;;  %p182_p11 = scmp.eq.s32.totalorder %s181_s11, 0 }
  0x13   : > { %1460 = sst [smem:[#allocation12_spill]] %s1459_s10  ;;  %260 = sbr.rel (%p257_p10) target bundleno = 1714 (0x6b2), region = 44 }
  0x14   : > { %s1271_s13 = scalar_select %p182_p11, %s1140_s23, %s184_s12  }
  0x15   : > { %s1450_s14 = sand.u32 (!%p257_p10), 1, %s1136_s22   ;;  %p300_p12 = scmp.lt.s32.totalorder (!%p257_p10), %s1148_s25, 1 }
  0x16   : > { %1461 = sst [smem:[#allocation13_spill]] %s1271_s13  ;;  %s924_s15 = sshll.u32 (!%p257_p10), %s1450_s14, 4 }
  0x17   : > { %p305_p13 = scmp.lt.s32.totalorder (!%p257_p10), %s1144_s24, 1  ;;  %s1298_s19 = scalar_lea.vmem (!%p257_p10), [#allocation4], %s924_s15 }
  0x18   : > { %s301_s16 = scalar_select %p300_p12, %s1148_s25, 1 }
  0x19   : > { %s306_s17 = scalar_select %p305_p13, %s1144_s24, 1 }
  0x1a   : > { %s955_s18 = sshll.u32 %s301_s16, 4  ;;  %p932_p0 = scmp.ne.s32.totalorder %s1144_s24, 0 }
  0x1b   : > { %s304_s29 = scalar_lea.vmem %s1440_s0, %s955_s18  ;;  %s956_s30 = sshll.u32 %s306_s17, 8 }
  0x1c   : > { %s1286_s8 = scalar_lea.vmem %s1443_s3, %s956_s30  ;;  %s929_s7 = sshll.u32 %s306_s17, 1 }
  0x1d   : > { %s1291_s13 = scalar_lea.vmem %s1444_s4, %s929_s7  ;;  %s957_s14 = sshll.u32 %s306_s17, 6 }
  0x1e   : > { %s1296_s16 = scalar_lea.vmem %s1445_s5, %s957_s14  ;;  %322 = sbr.rel (%p932_p0) target bundleno = 311 (0x137), region = 48 }
  0x23   : > { %v323_v0 = vld [vmem:[%s304_s29] sm:$0xff]  ;;  %v324_v1 = vld [vmem:[%s304_s29 + $0x8] sm:$0xff]  ;;  %v1162_v2 = vmov 128.0   ;;  %v1163_v20 = vmov 0.0  }
  0x24   : > { %327 = vadd.xlane.f32.xlu0 %v323_v0  ;;  %1039 = vrcp.f32 %v1162_v2  ;;  %386 = vst [vmem:[#allocation3 + $0x8] sm:$0xff] %v1163_v20  ;;  %v1037_v32 = vld [vmem:[%s1441_s1] ss:$0 sm:$0xff] }
  0x25   : > { %387 = vst [vmem:[#allocation3] sm:$0xff] %v1163_v20  ;;  %v1038_v35 = vld [vmem:[%s1442_s2] ss:$0 sm:$0xff] }
  0x2a   : > { %v1040_v3 = vpop.eup %1039 }
  0x2b   : > { %v332_v4 = vmul.f32 128.0, %v1040_v3  ;;  %vm336_vm0 = vweird.f32 %v1040_v3 }
  0x2c   : > { %329 = vadd.xlane.f32.xlu0 %v324_v1 }
  0x2d   : > { %v333_v5 = vsub.f32 1.0, %v332_v4 }
  0x2f   : > { %v334_v6 = vmul.f32 %v1040_v3, %v333_v5 }
  0x31   : > { %v335_v7 = vadd.f32 %v1040_v3, %v334_v6 }
  0x33   : > { %v337_v8 = vsel %vm336_vm0, %v1040_v3, %v335_v7 }
  0x97   : > { %v328_v9 = vpop.xlane.xlu0 %327 }
  0x98   : > { %v338_v10 = vmul.f32 %v337_v8, %v328_v9 }
  0x9a   : > { %v340_v11 = vsub.f32 %v323_v0, %v338_v10 }
  0x9c   : > { %v342_v12 = vmul.f32 %v340_v11, %v340_v11 }
  0x9e   : > { %344 = vadd.xlane.f32.xlu1 %v342_v12 }
  0x9f   : > { %v330_v13 = vpop.xlane.xlu0 %329 }
  0xa0   : > { %v339_v14 = vmul.f32 %v337_v8, %v330_v13 }
  0xa2   : > { %v341_v15 = vsub.f32 %v324_v1, %v339_v14 }
  0xa4   : > { %v343_v16 = vmul.f32 %v341_v15, %v341_v15 }
  0xa6   : > { %346 = vadd.xlane.f32.xlu1 %v343_v16 }
 0x111   : > { %v345_v17 = vpop.xlane.xlu1 %344 }
 0x112   : > { %v348_v18 = vmul.f32 %v345_v17, %v337_v8 }
 0x114   : > { %v350_v19 = vadd.f32 1e-06, %v348_v18 }
 0x116   : > { %1041 = vrsqrt.f32 %v350_v19  ;;  %vm358_vm2 = vweird.f32 %v350_v19 }
 0x119   : > { %v347_v21 = vpop.xlane.xlu1 %346 }
 0x11a   : > { %v349_v22 = vmul.f32 %v347_v21, %v337_v8 }
 0x11c   : > { %v1042_v23 = vpop.eup %1041  ;;  %v351_v24 = vadd.f32 1e-06, %v349_v22 }
 0x11d   : > { %v353_v25 = vmul.f32 %v1042_v23, %v350_v19  ;;  %vm359_vm1 = vweird.f32 %v1042_v23 }
 0x11e   : > { %1043 = vrsqrt.f32 %v351_v24  ;;  %vm360_vm3 = vmor %vm358_vm2, %vm359_vm1  ;;  %vm368_vm5 = vweird.f32 %v351_v24 }
 0x11f   : > { %v354_v26 = vmul.f32 %v1042_v23, %v353_v25 }
 0x121   : > { %v355_v27 = vmul.f32 0.5, %v354_v26 }
 0x123   : > { %v356_v28 = vsub.f32 1.5, %v355_v27 }
 0x124   : > { %v1044_v29 = vpop.eup %1043 }
 0x125   : > { %v357_v30 = vmul.f32 %v1042_v23, %v356_v28  ;;  %v363_v31 = vmul.f32 %v1044_v29, %v351_v24  ;;  %vm369_vm4 = vweird.f32 %v1044_v29 }
 0x126   : > { %vm370_vm6 = vmor %vm368_vm5, %vm369_vm4 }
 0x127   : > { %v361_v33 = vsel %vm360_vm3, %v1042_v23, %v357_v30  ;;  %v364_v34 = vmul.f32 %v1044_v29, %v363_v31 }
 0x128   : > { %v372_v36 = vmul.f32 %v361_v33, %v340_v11 }
 0x129   : > { %v365_v37 = vmul.f32 0.5, %v364_v34 }
 0x12a   : > { %v377_v38 = vmul.f32 %v1037_v32, %v372_v36 }
 0x12b   : > { %v366_v39 = vsub.f32 1.5, %v365_v37 }
 0x12c   : > { %v382_v40 = vadd.f32 %v1038_v35, %v377_v38 }
 0x12d   : > { %v367_v41 = vmul.f32 %v1044_v29, %v366_v39 }
 0x12e   : > { %384 = vst [vmem:[#allocation2] sm:$0xff] %v382_v40 }
 0x12f   : > { %v371_v42 = vsel %vm370_vm6, %v1044_v29, %v367_v41 }
 0x130   : > { %v373_v43 = vmul.f32 %v371_v42, %v341_v15 }
 0x132   : > { %v378_v44 = vmul.f32 %v1037_v32, %v373_v43 }
 0x134   : > { %v383_v45 = vadd.f32 %v1038_v35, %v378_v44 }
 0x136   : > { %385 = vst [vmem:[#allocation2 + $0x8] sm:$0xff] %v383_v45 }
 0x137 PF: > { %v420_v46 = vld [vmem:[%s1286_s8 + $0xf0] sm:$0xff]  ;;  %v418_v47 = vld [vmem:[%s1286_s8 + $0xe0] sm:$0xff]  ;;  %v421_v52 = vld [vmem:[%s1286_s8 + $0xf8] sm:$0xff]  ;;  %s1164_s10 = smov 64   ;;  %s1165_s14 = smov 32   ;;  %vm488_vm7 = vcmask 261120  }
 0x138   : > { %428 = vmatpush.msra.mxu0 %v420_v46  ;;  %v416_v48 = vld [vmem:[%s1286_s8 + $0xd0] sm:$0xff]  ;;  %v414_v49 = vld [vmem:[%s1286_s8 + $0xc0] sm:$0xff]  ;;  %v419_v53 = vld [vmem:[%s1286_s8 + $0xe8] sm:$0xff]  ;;  %451 = vmatpush.msra.mxu1 %v421_v52  ;;  %s1166_s15 = smov 96   ;;  %vm520_vm8 = vcmask 130048   ;;  %p949_p1 = scmp.ne.s32.totalorder %s1144_s24, 1 }
 0x139   : > { %v412_v50 = vld [vmem:[%s1286_s8 + $0xb0] sm:$0xff]  ;;  %v410_v51 = vld [vmem:[%s1286_s8 + $0xa0] sm:$0xff]  ;;  %v417_v55 = vld [vmem:[%s1286_s8 + $0xd8] sm:$0xff] }
 0x13a   : > { %429 = vmatpush.msra.mxu0 %v418_v47  ;;  %v408_v54 = vld [vmem:[%s1286_s8 + $0x90] sm:$0xff]  ;;  %452 = vmatpush.msra.mxu1 %v419_v53  ;;  %v406_v56 = vld [vmem:[%s1286_s8 + $0x80] sm:$0xff]  ;;  %v415_v57 = vld [vmem:[%s1286_s8 + $0xc8] sm:$0xff] }
 0x13b   : > { %v404_v58 = vld [vmem:[%s1286_s8 + $0x70] sm:$0xff]  ;;  %v413_v59 = vld [vmem:[%s1286_s8 + $0xb8] sm:$0xff]  ;;  %v402_v60 = vld [vmem:[%s1286_s8 + $0x60] sm:$0xff] }
 0x13c   : > { %430 = vmatpush.msra.mxu0 %v416_v48  ;;  %453 = vmatpush.msra.mxu1 %v417_v55  ;;  %v411_v61 = vld [vmem:[%s1286_s8 + $0xa8] sm:$0xff]  ;;  %v400_v62 = vld [vmem:[%s1286_s8 + $0x50] sm:$0xff]  ;;  %v409_v63 = vld [vmem:[%s1286_s8 + $0x98] sm:$0xff] }
 0x13d   : > { %v398_v0 = vld [vmem:[%s1286_s8 + $0x40] sm:$0xff]  ;;  %v407_v1 = vld [vmem:[%s1286_s8 + $0x88] sm:$0xff]  ;;  %v396_v2 = vld [vmem:[%s1286_s8 + $0x30] sm:$0xff] }
 0x13e   : > { %431 = vmatpush.msra.mxu0 %v414_v49  ;;  %454 = vmatpush.msra.mxu1 %v415_v57  ;;  %v405_v3 = vld [vmem:[%s1286_s8 + $0x78] sm:$0xff]  ;;  %v394_v4 = vld [vmem:[%s1286_s8 + $0x20] sm:$0xff]  ;;  %v403_v5 = vld [vmem:[%s1286_s8 + $0x68] sm:$0xff] }
 0x13f   : > { %v392_v6 = vld [vmem:[%s1286_s8 + $0x10] sm:$0xff]  ;;  %v401_v7 = vld [vmem:[%s1286_s8 + $0x58] sm:$0xff]  ;;  %v390_v8 = vld [vmem:[%s1286_s8] sm:$0xff] }
 0x140   : > { %432 = vmatpush.msra.mxu0 %v412_v50  ;;  %455 = vmatpush.msra.mxu1 %v413_v59  ;;  %v399_v9 = vld [vmem:[%s1286_s8 + $0x48] sm:$0xff]  ;;  %v388_v10 = vld [vmem:[#allocation2] sm:$0xff]  ;;  %v397_v11 = vld [vmem:[%s1286_s8 + $0x38] sm:$0xff] }
 0x141   : > { %v395_v12 = vld [vmem:[%s1286_s8 + $0x28] sm:$0xff]  ;;  %v393_v14 = vld [vmem:[%s1286_s8 + $0x18] sm:$0xff]  ;;  %v422_v17 = vld [vmem:[%s1291_s13] sm:$0x3] }
 0x142   : > { %433 = vmatpush.msra.mxu0 %v410_v51  ;;  %456 = vmatpush.msra.mxu1 %v411_v61  ;;  %v389_v13 = vld [vmem:[#allocation2 + $0x8] sm:$0xff]  ;;  %v424_v18 = vperm.slane %v422_v17, 0  ;;  %v425_v23 = vperm.slane %v422_v17, 1 }
 0x143   : > { %v391_v15 = vld [vmem:[%s1286_s8 + $0x8] sm:$0xff] }
 0x144   : > { %434 = vmatpush.msra.mxu0 %v408_v54  ;;  %457 = vmatpush.msra.mxu1 %v409_v63 }
 0x146   : > { %435 = vmatpush.msra.mxu0 %v406_v56  ;;  %458 = vmatpush.msra.mxu1 %v407_v1 }
 0x148   : > { %436 = vmatpush.msra.mxu0 %v404_v58  ;;  %459 = vmatpush.msra.mxu1 %v405_v3 }
 0x14a   : > { %437 = vmatpush.msra.mxu0 %v402_v60  ;;  %460 = vmatpush.msra.mxu1 %v403_v5 }
 0x14c   : > { %438 = vmatpush.msra.mxu0 %v400_v62  ;;  %461 = vmatpush.msra.mxu1 %v401_v7 }
 0x14e   : > { %439 = vmatpush.msra.mxu0 %v398_v0  ;;  %462 = vmatpush.msra.mxu1 %v399_v9 }
 0x150   : > { %440 = vmatpush.msra.mxu0 %v396_v2  ;;  %463 = vmatpush.msra.mxu1 %v397_v11 }
 0x152   : > { %441 = vmatpush.msra.mxu0 %v394_v4  ;;  %464 = vmatpush.msra.mxu1 %v395_v12 }
 0x154   : > { %442 = vmatpush.msra.mxu0 %v392_v6  ;;  %465 = vmatpush.msra.mxu1 %v393_v14 }
 0x156   : > { %443 = vmatpush.msra.mxu0 %v390_v8  ;;  %466 = vmatpush.msra.mxu1 %v391_v15 }
 0x157   : > { %444 = vmatmul.f32.vlgmr.msra.gmra.mxu0 %v388_v10  ;;  %467 = vmatmul.f32.vlgmr.msra.gmra.mxu1 %v388_v10 }
 0x15f   : > { %447 = vmatmul.f32.gmra.mxu0 %v389_v13  ;;  %470 = vmatmul.f32.gmra.mxu1 %v389_v13 }
 0x1d4   : > { %v445_v16 = vpop.f32.mrf.mxu0  ;;  %v468_v22 = vpop.f32.mrf.mxu1 }
 0x1d5   : > { %v446_v21 = vadd.f32 %v445_v16, %v424_v18  ;;  %v1341_v25 = vadd.f32 %v468_v22, %v425_v23 }
 0x1dc   : > { %v448_v19 = vpop.f32.mrf.mxu0  ;;  %v471_v24 = vpop.f32.mrf.mxu1 }
 0x1dd   : > { %v449_v20 = vadd.f32 %v448_v19, %v424_v18  ;;  %v1343_v26 = vadd.f32 %v471_v24, %v425_v23 }
 0x1df   : > { %486 = vrot.lane.b32.xlu0 %v449_v20, %s1164_s10  ;;  %v1045_v27 = vpack.i.bf16 %v1341_v25, %v1343_v26  ;;  %589 = vmatpush.msra.mxu3 %v1343_v26 }
 0x1e1   : > { %590 = vmatpush.msra.mxu3 %v1341_v25 }
 0x1e7   : > { %484 = vrot.lane.b32.xlu0 %v446_v21, %s1164_s10 }
 0x1ef   : > { %604 = vrot.lane.b32.xlu0 %v449_v20, %s1165_s14 }
 0x1f7   : > { %600 = vrot.lane.b32.xlu0 %v449_v20, %s1166_s15 }
 0x251   : > { %v487_v28 = vpop.permute.xlu0 %486 }
 0x252   : > { %933 = vmatpush.xpose.msk.msra.mxu2 %vm488_vm7, %v487_v28  ;;  %v476_v28 = vld [vmem:[%s1296_s16 + $0x10] sm:$0xff] }
 0x259   : > { %v485_v29 = vpop.permute.xlu0 %484 }
 0x25a   : > { %934 = vmatpush.xpose.msk.msra.mxu2 %vm488_vm7, %v485_v29  ;;  %v475_v29 = vld [vmem:[%s1296_s16 + $0x8] sm:$0xff] }
 0x25d   : > { %935 = vmatmul.msk.f32.vlgmr.msra.gmra.mxu2 %vm488_vm7, %v446_v21 }
 0x261   : > { %v605_v30 = vpop.permute.xlu0 %604 }
 0x262   : > { %939 = vmatpush.xpose.msk.msrb.mxu3 %vm488_vm7, %v605_v30 }
 0x265   : > { %936 = vmatmul.msk.f32.gmra.mxu2 %vm488_vm7, %v449_v20 }
 0x269   : > { %v601_v7 = vpop.permute.xlu0 %600 }
 0x2e0   : > { %v514_v31 = vpop.f32.mrf.mxu2 }
 0x2e1   : > { %v521_v32 = vsel %vm520_vm8, %v514_v31, -inf }
 0x2e2   : > { %522 = vmax.xlane.f32.xlu1 %v521_v32 }
 0x2e8   : > { %v517_v33 = vpop.f32.mrf.mxu2 }
 0x2e9   : > { %v524_v34 = vsel %vm520_vm8, %v517_v33, -inf }
 0x2ea   : > { %525 = vmax.xlane.f32.xlu1 %v524_v34 }
 0x303   : > { %602 = vrot.lane.b32.xlu1 %v446_v21, %s1165_s14 }
 0x355   : > { %v523_v35 = vpop.xlane.xlu1 %522 }
 0x356   : > { %v527_v36 = vsub.f32 %v514_v31, %v523_v35  ;;  %v474_v31 = vld [vmem:[%s1296_s16] sm:$0xff] }
 0x358   : > { %v529_v37 = vmul.f32 1.442695, %v527_v36 }
 0x35a   : > { %1050 = vpow2.f32 %v529_v37 }
 0x35d   : > { %v526_v38 = vpop.xlane.xlu1 %525 }
 0x35e   : > { %v528_v39 = vsub.f32 %v517_v33, %v526_v38 }
 0x360   : > { %v1051_v40 = vpop.eup %1050  ;;  %v531_v41 = vmul.f32 1.442695, %v528_v39  ;;  %v481_v39 = vld [vmem:[%s1296_s16 + $0x38] sm:$0xff] }
 0x361   : > { %v533_v42 = vsel %vm520_vm8, %v1051_v40, 0.0 }
 0x362   : > { %1052 = vpow2.f32 %v531_v41  ;;  %534 = vadd.xlane.f32.xlu2 %v533_v42  ;;  %v479_v42 = vld [vmem:[%s1296_s16 + $0x28] sm:$0xff] }
 0x368   : > { %v1053_v43 = vpop.eup %1052 }
 0x369   : > { %v536_v44 = vsel %vm520_vm8, %v1053_v43, 0.0 }
 0x36a   : > { %537 = vadd.xlane.f32.xlu2 %v536_v44 }
 0x375   : > { %v603_v45 = vpop.permute.xlu1 %602 }
 0x376   : > { %940 = vmatpush.xpose.msk.msrb.mxu3 %vm488_vm7, %v603_v45 }
 0x382   : > { %598 = vrot.lane.b32.xlu2 %v446_v21, %s1166_s15 }
 0x3d5   : > { %v535_v46 = vpop.xlane.xlu2 %534 }
 0x3d6   : > { %1054 = vrcp.f32 %v535_v46  ;;  %v550_v51 = vand.u32 2147483648, %v535_v46  ;;  %v548_v53 = vand.u32 2147483647, %v535_v46  ;;  %vm544_vm10 = vweird.f32 %v535_v46 }
 0x3d8   : > { %v551_v56 = vor.u32 1.1754944e-38, %v550_v51  ;;  %vm549_vm12 = vcmp.eq.f32.partialorder %v548_v53, 8.507059e+37 }
 0x3dc   : > { %v1055_v47 = vpop.eup %1054 }
 0x3dd   : > { %v540_v48 = vmul.f32 %v1055_v47, %v535_v46  ;;  %v538_v49 = vpop.xlane.xlu2 %537  ;;  %vm545_vm9 = vweird.f32 %v1055_v47 }
 0x3de   : > { %1056 = vrcp.f32 %v538_v49  ;;  %vm546_vm11 = vmor %vm544_vm10, %vm545_vm9  ;;  %v565_v62 = vand.u32 2147483648, %v538_v49  ;;  %v563_v0 = vand.u32 2147483647, %v538_v49  ;;  %vm559_vm14 = vweird.f32 %v538_v49 }
 0x3df   : > { %v541_v50 = vsub.f32 1.0, %v540_v48 }
 0x3e0   : > { %v566_v2 = vor.u32 1.1754944e-38, %v565_v62  ;;  %vm564_vm0 = vcmp.eq.f32.partialorder %v563_v0, 8.507059e+37 }
 0x3e1   : > { %v542_v52 = vmul.f32 %v1055_v47, %v541_v50 }
 0x3e3   : > { %v543_v54 = vadd.f32 %v1055_v47, %v542_v52 }
 0x3e4   : > { %v1057_v55 = vpop.eup %1056 }
 0x3e5   : > { %v555_v57 = vmul.f32 %v1057_v55, %v538_v49  ;;  %v547_v58 = vsel %vm546_vm11, %v1055_v47, %v543_v54  ;;  %vm560_vm13 = vweird.f32 %v1057_v55  ;;  %v599_v6 = vpop.permute.xlu2 %598  ;;  %v478_v47 = vld [vmem:[%s1296_s16 + $0x20] sm:$0xff] }
 0x3e6   : > { %v552_v59 = vsel %vm549_vm12, %v551_v56, %v547_v58  ;;  %vm561_vm15 = vmor %vm559_vm14, %vm560_vm13 }
 0x3e7   : > { %v556_v60 = vsub.f32 1.0, %v555_v57  ;;  %v553_v61 = vmul.f32 %v1051_v40, %v552_v59  ;;  %v480_v40 = vld [vmem:[%s1296_s16 + $0x30] sm:$0xff] }
 0x3e9   : > { %v557_v63 = vmul.f32 %v1057_v55, %v556_v60  ;;  %937 = vmatmul.msk.f32.vlgmr.msra.gmra.mxu3 %vm520_vm8, %v553_v61 }
 0x3ea   : > { %740 = vmatpush.msra.mxu3 %v481_v39 }
 0x3eb   : > { %v558_v1 = vadd.f32 %v1057_v55, %v557_v63  ;;  %v780_v63 = vld [vmem:[#allocation3 + $0x8] sm:$0xff] }
 0x3ec   : > { %741 = vmatpush.msra.mxu3 %v480_v40 }
 0x3ed   : > { %v562_v3 = vsel %vm561_vm15, %v1057_v55, %v558_v1 }
 0x3ee   : > { %v567_v4 = vsel %vm564_vm0, %v566_v2, %v562_v3  ;;  %742 = vmatpush.msra.mxu3 %v479_v42 }
 0x3ef   : > { %v568_v5 = vmul.f32 %v1053_v43, %v567_v4  ;;  %v781_v4 = vld [vmem:[#allocation3] sm:$0xff] }
 0x3f0   : > { %743 = vmatpush.msra.mxu3 %v478_v47 }
 0x3f1   : > { %938 = vmatmul.msk.f32.gmra.mxu3 %vm520_vm8, %v568_v5 }
 0x3f9   : > { %941 = vmatmul.msk.f32.vlgmr.msrb.gmra.mxu3 %vm488_vm7, %v599_v6 }
 0x401   : > { %942 = vmatmul.msk.f32.gmra.mxu3 %vm488_vm7, %v601_v7 }
 0x46c   : > { %v1364_v8 = vpop.f32.mrf.mxu3 }
 0x474   : > { %v1366_v9 = vpop.f32.mrf.mxu3 }
 0x47c   : > { %v631_v10 = vpop.f32.mrf.mxu3 }
 0x47d   : > { %v637_v11 = vsel %vm520_vm8, %v631_v10, -inf }
 0x47e   : > { %638 = vmax.xlane.f32.xlu0 %v637_v11 }
 0x484   : > { %v634_v12 = vpop.f32.mrf.mxu3 }
 0x485   : > { %v640_v13 = vsel %vm520_vm8, %v634_v12, -inf }
 0x486   : > { %641 = vmax.xlane.f32.xlu2 %v640_v13 }
 0x49e   : > { %1046 = vrot.lane.b32.xlu2 %v1045_v27, %s1166_s15  ;;  %v477_v27 = vld [vmem:[%s1296_s16 + $0x18] sm:$0xff] }
 0x4f1   : > { %v639_v14 = vpop.xlane.xlu0 %638 }
 0x4f2   : > { %v643_v15 = vsub.f32 %v631_v10, %v639_v14 }
 0x4f4   : > { %v645_v16 = vmul.f32 1.442695, %v643_v15 }
 0x4f6   : > { %1058 = vpow2.f32 %v645_v16 }
 0x4f9   : > { %v642_v17 = vpop.xlane.xlu2 %641 }
 0x4fa   : > { %v644_v18 = vsub.f32 %v634_v12, %v642_v17 }
 0x4fc   : > { %v1059_v19 = vpop.eup %1058  ;;  %v647_v20 = vmul.f32 1.442695, %v644_v18 }
 0x4fd   : > { %v649_v21 = vsel %vm520_vm8, %v1059_v19, 0.0 }
 0x4fe   : > { %1060 = vpow2.f32 %v647_v20  ;;  %650 = vadd.xlane.f32.xlu1 %v649_v21 }
 0x501   : > { %v1047_v22 = vpop.permute.xlu2 %1046 }
 0x502   : > { %v1048_v23 = vunpack.i.l.bf16 %v1047_v22  ;;  %v1049_v25 = vunpack.i.h.bf16 %v1047_v22 }
 0x504   : > { %v1061_v24 = vpop.eup %1060  ;;  %713 = vmatpush.msrb.mxu2 %v1048_v23 }
 0x505   : > { %v652_v26 = vsel %vm520_vm8, %v1061_v24, 0.0 }
 0x506   : > { %653 = vadd.xlane.f32.xlu0 %v652_v26  ;;  %714 = vmatpush.msrb.mxu2 %v1049_v25 }
 0x508   : > { %769 = vmatpush.msra.mxu2 %v477_v27 }
 0x50a   : > { %770 = vmatpush.msra.mxu2 %v476_v28 }
 0x50c   : > { %771 = vmatpush.msra.mxu2 %v475_v29 }
 0x50e   : > { %772 = vmatpush.msra.mxu2 %v474_v31 }
 0x571   : > { %v651_v30 = vpop.xlane.xlu1 %650 }
 0x572   : > { %1062 = vrcp.f32 %v651_v30  ;;  %v666_v36 = vand.u32 2147483648, %v651_v30  ;;  %v664_v38 = vand.u32 2147483647, %v651_v30  ;;  %vm660_vm2 = vweird.f32 %v651_v30 }
 0x574   : > { %v667_v44 = vor.u32 1.1754944e-38, %v666_v36  ;;  %vm665_vm4 = vcmp.eq.f32.partialorder %v664_v38, 8.507059e+37 }
 0x578   : > { %v1063_v32 = vpop.eup %1062 }
 0x579   : > { %v656_v33 = vmul.f32 %v1063_v32, %v651_v30  ;;  %v654_v34 = vpop.xlane.xlu0 %653  ;;  %vm661_vm1 = vweird.f32 %v1063_v32 }
 0x57a   : > { %1064 = vrcp.f32 %v654_v34  ;;  %vm662_vm3 = vmor %vm660_vm2, %vm661_vm1  ;;  %v681_v51 = vand.u32 2147483648, %v654_v34  ;;  %v679_v53 = vand.u32 2147483647, %v654_v34  ;;  %vm675_vm6 = vweird.f32 %v654_v34 }
 0x57b   : > { %v657_v35 = vsub.f32 1.0, %v656_v33 }
 0x57c   : > { %v682_v55 = vor.u32 1.1754944e-38, %v681_v51  ;;  %vm680_vm10 = vcmp.eq.f32.partialorder %v679_v53, 8.507059e+37 }
 0x57d   : > { %v658_v37 = vmul.f32 %v1063_v32, %v657_v35 }
 0x57f   : > { %v659_v41 = vadd.f32 %v1063_v32, %v658_v37 }
 0x580   : > { %v1065_v43 = vpop.eup %1064 }
 0x581   : > { %v663_v45 = vsel %vm662_vm3, %v1063_v32, %v659_v41  ;;  %v671_v46 = vmul.f32 %v1065_v43, %v654_v34  ;;  %vm676_vm5 = vweird.f32 %v1065_v43 }
 0x582   : > { %v668_v48 = vsel %vm665_vm4, %v667_v44, %v663_v45  ;;  %vm677_vm9 = vmor %vm675_vm6, %vm676_vm5 }
 0x583   : > { %v672_v49 = vsub.f32 1.0, %v671_v46  ;;  %v669_v50 = vmul.f32 %v1059_v19, %v668_v48 }
 0x585   : > { %v673_v52 = vmul.f32 %v1065_v43, %v672_v49  ;;  %943 = vmatmul.msk.f32.vlgmr.msrb.gmra.mxu2 %vm520_vm8, %v669_v50 }
 0x587   : > { %v674_v54 = vadd.f32 %v1065_v43, %v673_v52 }
 0x589   : > { %v678_v56 = vsel %vm677_vm9, %v1065_v43, %v674_v54 }
 0x58a   : > { %v683_v57 = vsel %vm680_vm10, %v682_v55, %v678_v56 }
 0x58b   : > { %v684_v58 = vmul.f32 %v1061_v24, %v683_v57 }
 0x58d   : > { %944 = vmatmul.msk.f32.gmra.mxu2 %vm520_vm8, %v684_v58 }
 0x595   : > { %947 = vmatmul.msk.f32.vlgmr.msra.gmra.mxu2 %vm488_vm7, %v1364_v8 }
 0x59d   : > { %948 = vmatmul.msk.f32.gmra.mxu2 %vm488_vm7, %v1366_v9 }
 0x608   : > { %v716_v59 = vpop.f32.mrf.mxu2 }
 0x609   : > { %945 = vmatmul.msk.f32.vlgmr.msra.gmra.mxu3 %vm488_vm7, %v716_v59 }
 0x610   : > { %v719_v60 = vpop.f32.mrf.mxu2 }
 0x611   : > { %946 = vmatmul.msk.f32.gmra.mxu3 %vm488_vm7, %v719_v60 }
 0x618   : > { %v774_v61 = vpop.f32.mrf.mxu2 }
 0x620   : > { %v777_v2 = vpop.f32.mrf.mxu2 }
 0x68c   : > { %v745_v62 = vpop.f32.mrf.mxu3 }
 0x68d   : > { %v775_v0 = vadd.f32 %v774_v61, %v745_v62 }
 0x68f   : > { %v782_v1 = vadd.f32 %v780_v63, %v775_v0 }
 0x691   : > { %784 = vst [vmem:[#allocation3 + $0x8] sm:$0xff] %v782_v1 }
 0x694   : > { %v748_v3 = vpop.f32.mrf.mxu3 }
 0x695   : > { %v778_v5 = vadd.f32 %v777_v2, %v748_v3  ;;  %789 = sbr.rel (%p949_p1) target bundleno = 1698 (0x6a2), region = 52 }
 0x697   : > { %v783_v6 = vadd.f32 %v781_v4, %v778_v5 }
 0x699   : > { %785 = vst [vmem:[#allocation3] sm:$0xff] %v783_v6 }
 0x69a   : > { %v790_v7 = vld [vmem:[#allocation3 + $0x8] sm:$0xff] }
 0x69b   : > { %792 = vst [vmem:[%s1298_s19] sm:$0xff] %v790_v7 }
 0x6a0   : > { %v791_v8 = vld [vmem:[#allocation3] sm:$0xff] }
 0x6a1   : > { %793 = vst [vmem:[%s1298_s19 + $0x8] sm:$0xff] %v791_v8 }
 0x6a2 PF: > { %s958_s8 = sshll.u32 %s1148_s25, 4  ;;  %s807_s20 = sshll.u32 %s1298_s19, 4  ;;  %s808_s20 = int_to_ptr.vmem [resolvable:$true] %s807_s20 }
 0x6a3   : > { %s806_s18 = scalar_lea.hbm %s1446_s6, %s958_s8  ;;  %s1462_s29 = sand.u32 1, %s1136_s22  }
 0x6a4   : > { %s809_s24 = sshll.u32 %s806_s18, 4  ;;  %s795_s30 = scalar_lea.sflag [#allocation5], %s1462_s29  ;;  %s810_s24 = int_to_ptr.hbm [resolvable:$true] %s809_s24 }
 0x6a5   : > { %s1080_s11 = sshra.s32 %s810_s24, 4  ;;  %s1086_s25 = scalar_lea.hbm %s1446_s6, 32  ;;  %s1081_s11 = int_to_ptr.hbm [resolvable:$true] %s1080_s11 }
 0x6a6   : > { %s1082_s12 = scalar_lea.hbm %s1081_s11, 16  ;;  %p1087_p6 = scmp.lt.s32.totalorder %s1081_s11, %s1446_s6 }
 0x6a7   : > { %p1083_p2 = scmp.ne.s32.totalorder %s1081_s11, %s1082_s12  ;;  %p1088_p7 = scmp.lt.s32.totalorder %s1086_s25, %s1082_s12 }
 0x6a9   : > { %p1084_p4 = pnand %p1083_p2, %p1253_p3  ;;  %p1089_p8 = por %p1088_p7, %p1087_p6 }
 0x6ab   : > { %p1085_p5 = pneg %p1084_p4 }
 0x6ad   : > { %p1090_p10 = pnand %p1089_p8, %p1085_p5 }
 0x6af   : > { %1093 = shalt.err (!%p1090_p10)
}
 0x6b0   : > { %s1167_s19 = smov 128   ;;  %s1168_s7 = smov 8  }
 0x6b1   : > { %959 = dma.vmem_to_hbm [thread:$0]  (%p1253_p3), %s808_s20, 256, %s810_s24, %s795_s30, %s1167_s19, %s1167_s19, %s1168_s7  }
 0x6b2 PF: > { %p965_p11 = scmp.ge.s32.totalorder %s1160_s28, 2  ;;  %s824_s14 = sand.u32 1, %s1132_s21  }
 0x6b3   : > { %s825_s15 = scalar_lea.sflag [#allocation5], %s824_s14 }
 0x6b4   : > { %p962_p12 = pnand %p965_p11, %p1263_p9 }
 0x6b6   : > { %p963_p13 = pneg %p962_p12 }
 0x6b8   : > { %1127 = dma.done.wait (%p963_p13), %s825_s15, 256  }
 0x6b9   : > { %1129 = vsyncadd (%p963_p13), %s825_s15, 4294967040  ;;  %s19_s28 = sadd.s32 1, %s1160_s28   ;;  %s1464_s8 = sld [smem:[#allocation7_spill]] }
 0x6ba   : > { %p16_p0 = scmp.ge.s32.totalorder %s19_s28, 6   ;;  %s1465_s23 = sld [smem:[#allocation13_spill]] }
 0x6bb   : > { %s1466_s24 = sld [smem:[#allocation8_spill]]  ;;  %s1470_s21 = smov %s1136_s22 }
 0x6bc   : > { %s1467_s25 = sld [smem:[#allocation9_spill]]  ;;  %18 = sbr.rel (!%p16_p0) target bundleno = 5 (0x5), region = 96 }
 0x6bd   : > { %s1468_s26 = sld [smem:[#allocation10_spill]] }
 0x6be   : > { %s1469_s27 = sld [smem:[#allocation11_spill]] }
 0x6bf   : > { %s1471_s22 = smov %s1464_s8 }
 0x6c1   :  { %831 = vsyncpa [#allocation5], 1 }
 0x6c2   :  { %833 = vsyncpa [#allocation5 + $0x1], 1 }

</bundles_post_ra>
